<compile_context>
chip_gen: v7x
topology: tpu7x:2x2x1
jax: 0.10.0
libtpu: 0.0.40
codegen_flags: <defaults>
</compile_context>

<pallas_src>
import functools

import jax
import jax.numpy as jnp
from jax.experimental import pallas as pl
from jax.experimental.pallas import tpu as pltpu

_LANES = 512          # lane-dense output width (multiple of 128)
_MAX_BLOCK_ROWS = 64  # 64 x 512 x 4 B = 128 KiB per block per operand


def _range_reduce_kernel(bits_ref, out_ref, *, n, n_is_pow2):
    """Map raw 32-bit random words to uniform int32 indices in [0, n)."""
    bits = bits_ref[...]                                   # uint32 words
    if n_is_pow2:
        # Power-of-two range: single AND replaces the modulo entirely.
        idx = (bits & jnp.uint32(n - 1)).astype(jnp.int32)
    else:
        # Top 24 random bits -> f32 in [0, 2^24), scale to [0, n), truncate.
        # TODO(synk): like modulo-based randint this has a ~n/2^24 uniformity
        # bias, negligible for point-cloud sized N.
        top = (bits >> jnp.uint32(8)).astype(jnp.int32).astype(jnp.float32)
        idx = (top * jnp.float32(n * (2.0 ** -24))).astype(jnp.int32)
        idx = jnp.minimum(idx, jnp.int32(n - 1))           # guard f32 round-up
    out_ref[...] = idx


def _round_up(x, m):
    return ((x + m - 1) // m) * m


def random_indices(pts, P, key=None, *, seed=0, force_pallas=False):
    """Pallas equivalent of the PyTorch `random_indices` module forward."""
    B, N, _ = pts.shape
    assert 1 <= N <= 2**31 - 1, "int32 indices require N < 2^31"
    if key is None:
        key = jax.random.PRNGKey(seed)

    total = B * P
    # Tiny outputs are 100% launch-overhead bound in a Pallas kernel.
    if not force_pallas and total < (1 << 14):
        return jax.random.randint(key, (B, P), 0, N, dtype=jnp.int32)

    # Lane-dense slab layout: (rows, 512) int32, tiled in (block_rows, 512).
    rows = max(_round_up(pl.cdiv(total, _LANES), 8), 8)
    if rows > _MAX_BLOCK_ROWS:
        rows = _round_up(rows, _MAX_BLOCK_ROWS)
        block_rows = _MAX_BLOCK_ROWS
    else:
        block_rows = rows
    num_blocks = rows // block_rows

    # Raw random words (portable; generated once so tiles never repeat bits).
    bits = jax.random.bits(key, (rows, _LANES), dtype=jnp.uint32)

    n_is_pow2 = (N & (N - 1)) == 0
    kernel = functools.partial(_range_reduce_kernel, n=N, n_is_pow2=n_is_pow2)

    slab = pl.pallas_call(
        kernel,
        out_shape=jax.ShapeDtypeStruct((rows, _LANES), jnp.int32),
        grid=(num_blocks,),
        in_specs=[pl.BlockSpec((block_rows, _LANES), lambda i: (i, 0))],
        out_specs=pl.BlockSpec((block_rows, _LANES), lambda i: (i, 0)),
        compiler_params=pltpu.CompilerParams(
            dimension_semantics=("parallel",),
        ),
    )(bits)

    return slab.reshape(-1)[:total].reshape(B, P)


if __name__ == "__main__":
    # Small shapes consistent with the module: B=2 clouds, N=16 points,
    # 3 coords each; sample P=8 indices per cloud.
    B, N, P = 2, 16, 8
    key = jax.random.PRNGKey(0)
    kpts, kidx = jax.random.split(key)
    pts = jax.random.normal(kpts, (B, N, 3), dtype=jnp.float32)

    # force_pallas=True so the kernel path is exercised even at tiny sizes.
    idx = random_indices(pts, P, key=kidx, force_pallas=True)
    idx = jax.block_until_ready(idx)

    assert idx.shape == (B, P), idx.shape
    assert idx.dtype == jnp.int32, idx.dtype
    assert bool(jnp.all(idx >= 0)) and bool(jnp.all(idx < N)), "indices out of range"

    # Also cover the non-power-of-two N path (float range reduction).
    pts2 = jax.random.normal(kpts, (2, 100, 3), dtype=jnp.float32)
    idx2 = jax.block_until_ready(
        random_indices(pts2, 24, key=kidx, force_pallas=True))
    assert idx2.shape == (2, 24)
    assert bool(jnp.all(idx2 >= 0)) and bool(jnp.all(idx2 < 100)), "indices out of range"

    print("KERNEL_OK")
</pallas_src>

<mosaic_0001>
module attributes {stable_mosaic.version = 11 : i64} {
  func.func @_range_reduce_kernel(%arg0: i32, %arg1: memref<8x512xi32, #tpu.memory_space<vmem>>, %arg2: memref<8x512xi32, #tpu.memory_space<vmem>>) attributes {dimension_semantics = [#tpu.dimension_semantics<parallel>], iteration_bounds = array<i64: 1>, scalar_prefetch = 0 : i64, scratch_operands = 0 : i64, tpu.core_type = #tpu.core_type<tc>, window_params = [{transform_indices = @transform_0, window_bounds = array<i64: 8, 512>}, {transform_indices = @transform_1, window_bounds = array<i64: 8, 512>}]} {
    %c0 = arith.constant 0 : index
    %c0_0 = arith.constant 0 : index
    %0 = vector.load %arg1[%c0, %c0_0] : memref<8x512xi32, #tpu.memory_space<vmem>>, vector<8x512xi32>
    %c15_i32 = arith.constant 15 : i32
    %1 = vector.broadcast %c15_i32 : i32 to vector<8x512xi32>
    %2 = arith.andi %0, %1 : vector<8x512xi32>
    %c0_1 = arith.constant 0 : index
    %c0_2 = arith.constant 0 : index
    %3 = vector.load %arg2[%c0_1, %c0_2] : memref<8x512xi32, #tpu.memory_space<vmem>>, vector<8x512xi32>
    tpu.vector_store %arg2[%c0_1, %c0_2], %2 {strides = array<i32>} : memref<8x512xi32, #tpu.memory_space<vmem>>, vector<8x512xi32>,
    return
  }
  func.func @transform_0(%arg0: i32) -> (i32, i32) {
    %c0_i32 = arith.constant 0 : i32
    %c0_i32_0 = arith.constant 0 : i32
    return %arg0, %c0_i32 : i32, i32
  }
  func.func @transform_1(%arg0: i32) -> (i32, i32) {
    %c0_i32 = arith.constant 0 : i32
    %c0_i32_0 = arith.constant 0 : i32
    return %arg0, %c0_i32 : i32, i32
  }
}

</mosaic_0001>

<bundles_post_ra>
// kernel: tpu_custom_call.1
= control target key start
LH: loop header
LB: loop body
LE: loop exit
PB: predicated region body
PF: predicated region fallthrough
CT: control target
= control target key end

     0   :  { %6 = vsyncpa [#allocation3], 0  ;;  %s134_s0 = inlined_call_operand.hbm [shape: u32[8,512], index: 0, kind: input, shape index: {}]   ;;  %s135_s1 = inlined_call_operand.hbm [shape: s32[8,512], index: 1, kind: output, shape index: {}]  }
   0x1   :  { %7 = vsyncpa [#allocation4], 0  ;;  %s98_s6 = smov [#allocation2]   ;;  %s50_s10 = scalar_lea.hbm %s134_s0, 512 }
   0x2   :  { %s14_s7 = sshll.u32 %s98_s6, 4  ;;  %p51_p0 = scmp.ne.s32.totalorder %s134_s0, %s50_s10  ;;  %s15_s7 = int_to_ptr.vmem [resolvable:$true] %s14_s7 }
   0x3   :  { %p54_p1 = scmp.lt.u32.totalorder %s50_s10, %s134_s0 }
   0x5   :  { %p56_p2 = pnand %p54_p1, %p51_p0 }
   0x7   :  { %59 = shalt.err (!%p56_p2)
}
   0x8   :  { %s60_s15 = scalar_lea.vmem %s15_s7, 512  ;;  %p65_p4 = scmp.lt.s32.totalorder %s15_s7, %s15_s7 }
   0x9   :  { %p61_p3 = scmp.ne.s32.totalorder %s15_s7, %s60_s15  ;;  %p66_p5 = scmp.lt.s32.totalorder %s60_s15, %s60_s15 }
   0xb   :  { %p67_p6 = por %p66_p5, %p65_p4 }
   0xd   :  { %p68_p7 = pnand %p67_p6, %p61_p3 }
   0xf   :  { %71 = shalt.err (!%p68_p7)
}
  0x10   :  { %17 = dma.hbm_to_vmem [thread:$0]  %s134_s0, 512, %s15_s7, [#allocation3]  }
  0x11   :  { %94 = dma.done.wait [#allocation3], 512  }
  0x12   :  { %95 = vsyncadd [#allocation3], 4294966784  ;;  %s99_s18 = smov [#allocation5]   ;;  %v21_v0 = vld [vmem:[#allocation2] sm:$0xff]  ;;  %v22_v1 = vld [vmem:[#allocation2 + $0x8] sm:$0xff] }
  0x13   :  { %s39_s19 = sshll.u32 %s99_s18, 4  ;;  %v23_v2 = vld [vmem:[#allocation2 + $0x10] sm:$0xff]  ;;  %v25_v3 = vand.u32 15, %v21_v0  ;;  %v26_v4 = vand.u32 15, %v22_v1  ;;  %v24_v6 = vld [vmem:[#allocation2 + $0x18] sm:$0xff]  ;;  %s40_s19 = int_to_ptr.vmem [resolvable:$true] %s39_s19 }
  0x14   :  { %v27_v5 = vand.u32 15, %v23_v2  ;;  %v28_v7 = vand.u32 15, %v24_v6  ;;  %s72_s20 = scalar_lea.vmem %s40_s19, 512  ;;  %p77_p9 = scmp.lt.s32.totalorder %s40_s19, %s40_s19 }
  0x15   :  { %29 = vst [vmem:[#allocation5] sm:$0xff] %v25_v3  ;;  %30 = vst [vmem:[#allocation5 + $0x8] sm:$0xff] %v26_v4  ;;  %p73_p8 = scmp.ne.s32.totalorder %s40_s19, %s72_s20  ;;  %p78_p10 = scmp.lt.s32.totalorder %s72_s20, %s72_s20 }
  0x16   :  { %31 = vst [vmem:[#allocation5 + $0x10] sm:$0xff] %v27_v5  ;;  %32 = vst [vmem:[#allocation5 + $0x18] sm:$0xff] %v28_v7 }
  0x17   :  { %p79_p11 = por %p78_p10, %p77_p9 }
  0x19   :  { %p80_p12 = pnand %p79_p11, %p73_p8 }
  0x1b   :  { %83 = shalt.err (!%p80_p12)
}
  0x1c   :  { %s84_s22 = scalar_lea.hbm %s135_s1, 512 }
  0x1d   :  { %p85_p13 = scmp.ne.s32.totalorder %s135_s1, %s84_s22  ;;  %p88_p0 = scmp.lt.u32.totalorder %s84_s22, %s135_s1 }
  0x1f   :  { %p90_p1 = pnand %p88_p0, %p85_p13 }
  0x21   :  { %93 = shalt.err (!%p90_p1)
}
  0x22   :  { %42 = dma.vmem_to_hbm [thread:$0]  %s40_s19, 512, %s135_s1, [#allocation4]  }
  0x23   :  { %96 = dma.done.wait [#allocation4], 512  }
  0x24   :  { %97 = vsyncadd [#allocation4], 4294966784 }
  0x25   :  { %46 = vsyncpa [#allocation3], 1 }
  0x26   :  { %47 = vsyncpa [#allocation4], 1 }

</bundles_post_ra>
